<compile_context>
chip_gen: v7x
topology: tpu7x:2x2x1
jax: 0.10.0
libtpu: 0.0.40
codegen_flags: <defaults>
</compile_context>

<pallas_src>
import functools

import jax
import jax.numpy as jnp
import numpy as np
from jax.experimental import pallas as pl
from jax.experimental.pallas import tpu as pltpu

BN_EPS = 1e-5
_ROW_TILE_MAX = 2048            # max time rows per grid step
_TILE_F32_BYTES = 4 << 20       # cap for per-tile f32 intermediates
_FUSED_VMEM_BUDGET = 44 << 20   # resident-footprint budget for the fused avg+apply pass
_VMEM_LIMIT_CAP = 56 << 20      # stay under v7x's 64 MiB VMEM


def _row_mask(t_tile, tile_rows, seq_len):
    row = t_tile * tile_rows + jax.lax.broadcasted_iota(jnp.int32, (tile_rows, 1), 0)
    return row < seq_len


def _pick_tiles(T, C):
    """Balanced time tiles: multiples of 8, even split, bounded f32 intermediates."""
    cap_c = max(128, (_TILE_F32_BYTES // (C * 4)) // 8 * 8)
    row_cap = min(_ROW_TILE_MAX, cap_c)
    if T <= row_cap:
        return T, 1
    nt = pl.cdiv(T, row_cap)
    tt = ((pl.cdiv(T, nt) + 7) // 8) * 8
    return tt, pl.cdiv(T, tt)


# --------------------------------------------------------------------------- kernels
def _stats_kernel(x_ref, w_ref, b_ref, psum_ref, psumsq_ref, *, seq_len, tile_rows):
    """Pass 1: per-batch partial sum / sum-of-squares of h = x @ W + b (BN statistics)."""
    t = pl.program_id(1)

    @pl.when(t == 0)
    def _():
        psum_ref[...] = jnp.zeros_like(psum_ref)
        psumsq_ref[...] = jnp.zeros_like(psumsq_ref)

    xv = x_ref[0]                                           # (TT, C), input dtype
    h = jnp.dot(xv, w_ref[...], preferred_element_type=jnp.float32) + b_ref[...]

    if seq_len % tile_rows:                                 # static: mask only partial tiles
        h = jnp.where(_row_mask(t, tile_rows, seq_len), h, 0.0)

    psum_ref[...] += jnp.sum(h, axis=0, keepdims=True)[None]
    psumsq_ref[...] += jnp.sum(h * h, axis=0, keepdims=True)[None]


def _fused_kernel(x_ref, w_ref, b_ref, w1_ref, b1_ref, w2_ref, b2_ref,
                  o_ref, tsum_ref, *, seq_len, tile_rows, n_tiles):
    """Fused pass 2+3: g = sigmoid(BN(conv(x))) written into the per-batch resident
    output block; time-average + SE bottleneck computed at the last tile; block scaled
    in place by s before writeback."""
    t = pl.program_id(1)

    g = jax.nn.sigmoid(
        jnp.dot(x_ref[0], w_ref[...], preferred_element_type=jnp.float32) + b_ref[...])

    def bottleneck(avg):                                    # avg: (1, C) f32
        z = jax.nn.sigmoid(
            jnp.dot(avg, w1_ref[...], preferred_element_type=jnp.float32) + b1_ref[...])
        return jax.nn.sigmoid(
            jnp.dot(z, w2_ref[...], preferred_element_type=jnp.float32) + b2_ref[...])

    if n_tiles == 1:
        # Single tile: everything static, no scratch accumulation / read-back needed.
        avg = jnp.sum(g, axis=0, keepdims=True) * (1.0 / seq_len)
        s = bottleneck(avg)                                 # (1, C)
        o_ref[...] = (g * s)[None].astype(o_ref.dtype)
        return

    @pl.when(t == 0)
    def _():
        tsum_ref[...] = jnp.zeros_like(tsum_ref)

    g_sum = g
    if seq_len % tile_rows:                                 # static: mask partial tiles only
        g_sum = jnp.where(_row_mask(t, tile_rows, seq_len), g, 0.0)
    tsum_ref[...] += jnp.sum(g_sum, axis=0, keepdims=True)

    last_start = (n_tiles - 1) * tile_rows                  # static
    last_rows = seq_len - last_start                        # static, in (0, tile_rows]

    @pl.when(t < n_tiles - 1)
    def _():
        start = pl.multiple_of(t * tile_rows, 8)
        o_ref[:, pl.ds(start, tile_rows), :] = g[None].astype(o_ref.dtype)

    @pl.when(t == n_tiles - 1)
    def _():
        o_ref[:, last_start:last_start + last_rows, :] = g[:last_rows][None].astype(o_ref.dtype)
        avg = tsum_ref[...] * (1.0 / seq_len)               # (1, C)
        s = bottleneck(avg)                                 # (1, C)
        o_ref[...] = (o_ref[...].astype(jnp.float32) * s[None]).astype(o_ref.dtype)


def _avg_kernel(x_ref, w_ref, b_ref, tsum_ref, *, seq_len, tile_rows):
    """Fallback pass 2: per-batch time sums of sigmoid(BN(conv(x)))."""
    t = pl.program_id(1)

    @pl.when(t == 0)
    def _():
        tsum_ref[...] = jnp.zeros_like(tsum_ref)

    g = jax.nn.sigmoid(
        jnp.dot(x_ref[0], w_ref[...], preferred_element_type=jnp.float32) + b_ref[...])
    if seq_len % tile_rows:
        g = jnp.where(_row_mask(t, tile_rows, seq_len), g, 0.0)
    tsum_ref[...] += jnp.sum(g, axis=0, keepdims=True)[None]


def _apply_kernel(x_ref, w_ref, b_ref, s_ref, o_ref):
    """Fallback pass 3: out = sigmoid(BN(conv(x))) * s (s precomputed in XLA)."""
    g = jax.nn.sigmoid(
        jnp.dot(x_ref[0], w_ref[...], preferred_element_type=jnp.float32) + b_ref[...])
    o_ref[...] = (g[None] * s_ref[...]).astype(o_ref.dtype)


# --------------------------------------------------------------------------- wrapper
@functools.partial(jax.jit, static_argnames=("fused",))
def se_module(x, wdw, bdw, wpw, bpw, gamma, beta, w1, b1, w2, b2, fused=None):
    B, T, C = x.shape
    inner = w1.shape[1]
    dtype = x.dtype
    itemsize = jnp.dtype(dtype).itemsize

    # ---- fold depthwise (k=1) conv into the pointwise matmul ----
    w_fold = (wdw[0][:, None] * wpw).astype(jnp.float32)          # (C, C)
    b_fold = (bdw[0] @ wpw + bpw[0]).astype(jnp.float32)          # (C,)

    TT, NT = _pick_tiles(T, C)
    grid = (B, NT)

    x_spec = pl.BlockSpec((1, TT, C), lambda b, t: (b, t, 0))
    w_spec = pl.BlockSpec((C, C), lambda b, t: (0, 0))
    vec_spec = pl.BlockSpec((1, C), lambda b, t: (0, 0))
    acc_spec = pl.BlockSpec((1, 1, C), lambda b, t: (b, 0, 0))

    w_cast = w_fold.astype(dtype)
    b_row = b_fold.reshape(1, C)

    # ---- VMEM footprints (double-buffered x tile, resident weights, f32 intermediates) ----
    xblk = TT * C * itemsize
    wbytes = C * C * itemsize
    f32tile = TT * C * 4
    stream_need = 2 * xblk + 2 * wbytes + 4 * f32tile + (4 << 20)
    stream_limit = int(min(max(stream_need, 32 << 20), _VMEM_LIMIT_CAP))
    stream_params = pltpu.CompilerParams(
        dimension_semantics=("parallel", "arbitrary"),
        vmem_limit_bytes=stream_limit,
    )

    # ---- pass 1: BatchNorm batch statistics (train mode, biased variance) ----
    psum, psumsq = pl.pallas_call(
        functools.partial(_stats_kernel, seq_len=T, tile_rows=TT),
        out_shape=(jax.ShapeDtypeStruct((B, 1, C), jnp.float32),
                   jax.ShapeDtypeStruct((B, 1, C), jnp.float32)),
        grid=grid,
        in_specs=[x_spec, w_spec, vec_spec],
        out_specs=(acc_spec, acc_spec),
        compiler_params=stream_params,
    )(x, w_cast, b_row)

    n = jnp.float32(B * T)
    mean = jnp.sum(psum[:, 0, :], axis=0) / n                     # (C,)
    var = jnp.maximum(jnp.sum(psumsq[:, 0, :], axis=0) / n - mean * mean, 0.0)
    bn_scale = gamma[0].astype(jnp.float32) * jax.lax.rsqrt(var + BN_EPS)
    bn_bias = beta[0].astype(jnp.float32) - mean * bn_scale

    # fold the BN affine into the conv weights for the remaining pass(es)
    w_bn = (w_fold * bn_scale[None, :]).astype(dtype)
    b_bn = (b_fold * bn_scale + bn_bias).reshape(1, C)

    w1_f = w1.astype(jnp.float32)
    b1_f = b1.reshape(1, inner).astype(jnp.float32)
    w2_f = w2.astype(jnp.float32)
    b2_f = b2.reshape(1, C).astype(jnp.float32)

    # ---- fused avg + apply: per-batch output resident in VMEM (one x traversal) ----
    out_res = T * C * itemsize
    fused_need = 2 * xblk + 2 * out_res + T * C * 4 + 2 * wbytes + 4 * f32tile + (4 << 20)
    if fused is None:
        fused = fused_need <= _FUSED_VMEM_BUDGET

    if fused:
        fused_params = pltpu.CompilerParams(
            dimension_semantics=("parallel", "arbitrary"),
            vmem_limit_bytes=int(min(max(fused_need, 32 << 20), _VMEM_LIMIT_CAP)),
        )
        return pl.pallas_call(
            functools.partial(_fused_kernel, seq_len=T, tile_rows=TT, n_tiles=NT),
            out_shape=jax.ShapeDtypeStruct((B, T, C), dtype),
            grid=grid,
            in_specs=[x_spec, w_spec, vec_spec,
                      pl.BlockSpec((C, inner), lambda b, t: (0, 0)),
                      pl.BlockSpec((1, inner), lambda b, t: (0, 0)),
                      pl.BlockSpec((inner, C), lambda b, t: (0, 0)),
                      vec_spec],
            out_specs=pl.BlockSpec((1, T, C), lambda b, t: (b, 0, 0)),
            scratch_shapes=[pltpu.VMEM((1, C), jnp.float32)],
            compiler_params=fused_params,
        )(x, w_bn, b_bn, w1_f, b1_f, w2_f, b2_f)

    # ---- fallback (very long T): unfused avg pass + XLA bottleneck + parallel apply ----
    tsum = pl.pallas_call(
        functools.partial(_avg_kernel, seq_len=T, tile_rows=TT),
        out_shape=jax.ShapeDtypeStruct((B, 1, C), jnp.float32),
        grid=grid,
        in_specs=[x_spec, w_spec, vec_spec],
        out_specs=acc_spec,
        compiler_params=stream_params,
    )(x, w_bn, b_bn)

    avg = tsum[:, 0, :] / jnp.float32(T)                          # (B, C)
    z = jax.nn.sigmoid(avg @ w1_f + b1_f)
    s = jax.nn.sigmoid(z @ w2_f + b2_f).reshape(B, 1, C)

    apply_params = pltpu.CompilerParams(
        dimension_semantics=("parallel", "parallel"),
        vmem_limit_bytes=stream_limit,
    )
    return pl.pallas_call(
        _apply_kernel,
        out_shape=jax.ShapeDtypeStruct((B, T, C), dtype),
        grid=grid,
        in_specs=[x_spec, w_spec, vec_spec, acc_spec],
        out_specs=x_spec,
        compiler_params=apply_params,
    )(x, w_bn, b_bn, s)


def se_module_ref(x, wdw, bdw, wpw, bpw, gamma, beta, w1, b1, w2, b2):
    """Pure-JAX reference with identical semantics."""
    h = x * wdw[0] + bdw[0]
    h = jnp.einsum('btc,co->bto', h, wpw) + bpw[0]
    mean = jnp.mean(h, axis=(0, 1), keepdims=True)
    var = jnp.mean((h - mean) ** 2, axis=(0, 1), keepdims=True)
    h = (h - mean) * jax.lax.rsqrt(var + BN_EPS) * gamma[0] + beta[0]
    h = jax.nn.sigmoid(h)
    avg = jnp.mean(h, axis=1)
    z = jax.nn.sigmoid(avg @ w1 + b1[0])
    s = jax.nn.sigmoid(z @ w2 + b2[0])
    return h * s[:, None, :]


if __name__ == "__main__":
    key = jax.random.PRNGKey(0)

    # Case 1: small single-tile.  Case 2: longer T, still one balanced tile.
    # Case 3: T > row cap -> multi-tile fused path with a partial last tile.
    cases = [(2, 16, 8, 4), (2, 600, 8, 4), (2, 2600, 8, 4)]
    for idx, (B, T, C, INNER) in enumerate(cases):
        key, *ks = jax.random.split(key, 9)
        x = jax.random.normal(ks[0], (B, T, C), dtype=jnp.float32)

        wdw = 0.5 + 0.1 * jax.random.normal(ks[1], (1, C), jnp.float32)   # depthwise w (k=1)
        bdw = 0.1 * jax.random.normal(ks[2], (1, C), jnp.float32)         # depthwise b
        wpw = jax.random.normal(ks[3], (C, C), jnp.float32) / np.sqrt(C)  # pointwise W^T
        bpw = 0.1 * jax.random.normal(ks[4], (1, C), jnp.float32)
        gamma = jnp.ones((1, C), jnp.float32)                             # BN weight
        beta = jnp.zeros((1, C), jnp.float32)                             # BN bias
        w1 = jax.random.normal(ks[5], (C, INNER), jnp.float32) / np.sqrt(C)
        b1 = 0.1 * jax.random.normal(ks[6], (1, INNER), jnp.float32)
        w2 = jax.random.normal(ks[7], (INNER, C), jnp.float32) / np.sqrt(INNER)
        b2 = jnp.zeros((1, C), jnp.float32)

        ref = se_module_ref(x, wdw, bdw, wpw, bpw, gamma, beta, w1, b1, w2, b2)

        modes = (None,) if idx < len(cases) - 1 else (None, False)        # also test fallback
        for mode in modes:
            out = jax.block_until_ready(
                se_module(x, wdw, bdw, wpw, bpw, gamma, beta, w1, b1, w2, b2, fused=mode))
            assert out.shape == (B, T, C)
            np.testing.assert_allclose(np.asarray(out), np.asarray(ref),
                                       rtol=1e-3, atol=1e-3)

    print("KERNEL_OK")
</pallas_src>

<mosaic_0001>
module attributes {stable_mosaic.version = 11 : i64} {
  func.func @_fused_kernel(%arg0: i32, %arg1: i32, %arg2: memref<1x16x8xf32, #tpu.memory_space<vmem>>, %arg3: memref<8x8xf32, #tpu.memory_space<vmem>>, %arg4: memref<1x8xf32, #tpu.memory_space<vmem>>, %arg5: memref<8x4xf32, #tpu.memory_space<vmem>>, %arg6: memref<1x4xf32, #tpu.memory_space<vmem>>, %arg7: memref<4x8xf32, #tpu.memory_space<vmem>>, %arg8: memref<1x8xf32, #tpu.memory_space<vmem>>, %arg9: memref<1x16x8xf32, #tpu.memory_space<vmem>>, %arg10: memref<1x8xf32, #tpu.memory_space<vmem>>) attributes {dimension_semantics = [#tpu.dimension_semantics<parallel>, #tpu.dimension_semantics<arbitrary>], iteration_bounds = array<i64: 2, 1>, scalar_prefetch = 0 : i64, scratch_operands = 1 : i64, tpu.core_type = #tpu.core_type<tc>, window_params = [{transform_indices = @transform_0, window_bounds = array<i64: 1, 16, 8>}, {pipeline_mode = #tpu.pipeline_mode<synchronous>, transform_indices = @transform_1, window_bounds = array<i64: 8, 8>}, {pipeline_mode = #tpu.pipeline_mode<synchronous>, transform_indices = @transform_2, window_bounds = array<i64: 1, 8>}, {pipeline_mode = #tpu.pipeline_mode<synchronous>, transform_indices = @transform_3, window_bounds = array<i64: 8, 4>}, {pipeline_mode = #tpu.pipeline_mode<synchronous>, transform_indices = @transform_4, window_bounds = array<i64: 1, 4>}, {pipeline_mode = #tpu.pipeline_mode<synchronous>, transform_indices = @transform_5, window_bounds = array<i64: 4, 8>}, {pipeline_mode = #tpu.pipeline_mode<synchronous>, transform_indices = @transform_6, window_bounds = array<i64: 1, 8>}, {transform_indices = @transform_7, window_bounds = array<i64: 1, 16, 8>}]} {
    %c0 = arith.constant 0 : index
    %c0_0 = arith.constant 0 : index
    %c0_1 = arith.constant 0 : index
    %0 = vector.load %arg2[%c0, %c0_0, %c0_1] : memref<1x16x8xf32, #tpu.memory_space<vmem>>, vector<1x16x8xf32>
    %1 = vector.shape_cast %0 : vector<1x16x8xf32> to vector<16x8xf32>
    %c0_2 = arith.constant 0 : index
    %c0_3 = arith.constant 0 : index
    %2 = vector.load %arg3[%c0_2, %c0_3] : memref<8x8xf32, #tpu.memory_space<vmem>>, vector<8x8xf32>
    %cst = arith.constant dense<0.000000e+00> : vector<16x8xf32>
    %3 = tpu.matmul %1, %2, %cst {dimension_numbers = #tpu.dot_dimension_numbers<[1], [0], [0], [1], [0, 0, 1, 1], [], []>} : vector<16x8xf32>, vector<8x8xf32>, vector<16x8xf32> -> vector<16x8xf32>
    %c0_4 = arith.constant 0 : index
    %c0_5 = arith.constant 0 : index
    %4 = vector.load %arg4[%c0_4, %c0_5] : memref<1x8xf32, #tpu.memory_space<vmem>>, vector<1x8xf32>
    %5 = vector.broadcast %4 : vector<1x8xf32> to vector<16x8xf32>
    %6 = arith.addf %3, %5 : vector<16x8xf32>
    %7 = arith.negf %6 : vector<16x8xf32>
    %8 = math.exp %7 : vector<16x8xf32>
    %cst_6 = arith.constant 1.000000e+00 : f32
    %9 = vector.broadcast %cst_6 : f32 to vector<16x8xf32>
    %10 = arith.addf %9, %8 : vector<16x8xf32>
    %11 = arith.divf %9, %10 : vector<16x8xf32>
    %cst_7 = arith.constant dense<0.000000e+00> : vector<8xf32>
    %12 = vector.multi_reduction <add>, %11, %cst_7 [0] : vector<16x8xf32> to vector<8xf32>
    %13 = vector.shape_cast %12 : vector<8xf32> to vector<1x8xf32>
    %cst_8 = arith.constant 6.250000e-02 : f32
    %14 = vector.broadcast %cst_8 : f32 to vector<1x8xf32>
    %15 = arith.mulf %13, %14 : vector<1x8xf32>
    %c0_9 = arith.constant 0 : index
    %c0_10 = arith.constant 0 : index
    %16 = vector.load %arg5[%c0_9, %c0_10] : memref<8x4xf32, #tpu.memory_space<vmem>>, vector<8x4xf32>
    %cst_11 = arith.constant dense<0.000000e+00> : vector<1x4xf32>
    %17 = tpu.matmul %15, %16, %cst_11 {dimension_numbers = #tpu.dot_dimension_numbers<[1], [0], [0], [1], [0, 0, 1, 1], [], []>} : vector<1x8xf32>, vector<8x4xf32>, vector<1x4xf32> -> vector<1x4xf32>
    %c0_12 = arith.constant 0 : index
    %c0_13 = arith.constant 0 : index
    %18 = vector.load %arg6[%c0_12, %c0_13] : memref<1x4xf32, #tpu.memory_space<vmem>>, vector<1x4xf32>
    %19 = arith.addf %17, %18 : vector<1x4xf32>
    %20 = arith.negf %19 : vector<1x4xf32>
    %21 = math.exp %20 : vector<1x4xf32>
    %cst_14 = arith.constant 1.000000e+00 : f32
    %22 = vector.broadcast %cst_14 : f32 to vector<1x4xf32>
    %23 = arith.addf %22, %21 : vector<1x4xf32>
    %24 = arith.divf %22, %23 : vector<1x4xf32>
    %c0_15 = arith.constant 0 : index
    %c0_16 = arith.constant 0 : index
    %25 = vector.load %arg7[%c0_15, %c0_16] : memref<4x8xf32, #tpu.memory_space<vmem>>, vector<4x8xf32>
    %cst_17 = arith.constant dense<0.000000e+00> : vector<1x8xf32>
    %26 = tpu.matmul %24, %25, %cst_17 {dimension_numbers = #tpu.dot_dimension_numbers<[1], [0], [0], [1], [0, 0, 1, 1], [], []>} : vector<1x4xf32>, vector<4x8xf32>, vector<1x8xf32> -> vector<1x8xf32>
    %c0_18 = arith.constant 0 : index
    %c0_19 = arith.constant 0 : index
    %27 = vector.load %arg8[%c0_18, %c0_19] : memref<1x8xf32, #tpu.memory_space<vmem>>, vector<1x8xf32>
    %28 = arith.addf %26, %27 : vector<1x8xf32>
    %29 = arith.negf %28 : vector<1x8xf32>
    %30 = math.exp %29 : vector<1x8xf32>
    %cst_20 = arith.constant 1.000000e+00 : f32
    %31 = vector.broadcast %cst_20 : f32 to vector<1x8xf32>
    %32 = arith.addf %31, %30 : vector<1x8xf32>
    %33 = arith.divf %31, %32 : vector<1x8xf32>
    %34 = vector.broadcast %33 : vector<1x8xf32> to vector<16x8xf32>
    %35 = arith.mulf %11, %34 : vector<16x8xf32>
    %36 = vector.shape_cast %35 : vector<16x8xf32> to vector<1x16x8xf32>
    %c0_21 = arith.constant 0 : index
    %c0_22 = arith.constant 0 : index
    %c0_23 = arith.constant 0 : index
    %37 = vector.load %arg9[%c0_21, %c0_22, %c0_23] : memref<1x16x8xf32, #tpu.memory_space<vmem>>, vector<1x16x8xf32>
    tpu.vector_store %arg9[%c0_21, %c0_22, %c0_23], %36 {strides = array<i32>} : memref<1x16x8xf32, #tpu.memory_space<vmem>>, vector<1x16x8xf32>,
    return
  }
  func.func @transform_0(%arg0: i32, %arg1: i32) -> (i32, i32, i32) {
    %c0_i32 = arith.constant 0 : i32
    %c0_i32_0 = arith.constant 0 : i32
    return %arg0, %arg1, %c0_i32 : i32, i32, i32
  }
  func.func @transform_1(%arg0: i32, %arg1: i32) -> (i32, i32) {
    %c0_i32 = arith.constant 0 : i32
    %c0_i32_0 = arith.constant 0 : i32
    %c0_i32_1 = arith.constant 0 : i32
    return %c0_i32, %c0_i32_0 : i32, i32
  }
  func.func @transform_2(%arg0: i32, %arg1: i32) -> (i32, i32) {
    %c0_i32 = arith.constant 0 : i32
    %c0_i32_0 = arith.constant 0 : i32
    %c0_i32_1 = arith.constant 0 : i32
    return %c0_i32, %c0_i32_0 : i32, i32
  }
  func.func @transform_3(%arg0: i32, %arg1: i32) -> (i32, i32) {
    %c0_i32 = arith.constant 0 : i32
    %c0_i32_0 = arith.constant 0 : i32
    %c0_i32_1 = arith.constant 0 : i32
    return %c0_i32, %c0_i32_0 : i32, i32
  }
  func.func @transform_4(%arg0: i32, %arg1: i32) -> (i32, i32) {
    %c0_i32 = arith.constant 0 : i32
    %c0_i32_0 = arith.constant 0 : i32
    %c0_i32_1 = arith.constant 0 : i32
    return %c0_i32, %c0_i32_0 : i32, i32
  }
  func.func @transform_5(%arg0: i32, %arg1: i32) -> (i32, i32) {
    %c0_i32 = arith.constant 0 : i32
    %c0_i32_0 = arith.constant 0 : i32
    %c0_i32_1 = arith.constant 0 : i32
    return %c0_i32, %c0_i32_0 : i32, i32
  }
  func.func @transform_6(%arg0: i32, %arg1: i32) -> (i32, i32) {
    %c0_i32 = arith.constant 0 : i32
    %c0_i32_0 = arith.constant 0 : i32
    %c0_i32_1 = arith.constant 0 : i32
    return %c0_i32, %c0_i32_0 : i32, i32
  }
  func.func @transform_7(%arg0: i32, %arg1: i32) -> (i32, i32, i32) {
    %c0_i32 = arith.constant 0 : i32
    %c0_i32_0 = arith.constant 0 : i32
    %c0_i32_1 = arith.constant 0 : i32
    return %arg0, %c0_i32, %c0_i32_0 : i32, i32, i32
  }
}

module attributes {stable_mosaic.version = 11 : i64} {
  func.func @_stats_kernel(%arg0: i32, %arg1: i32, %arg2: memref<1x16x8xf32, #tpu.memory_space<vmem>>, %arg3: memref<8x8xf32, #tpu.memory_space<vmem>>, %arg4: memref<1x8xf32, #tpu.memory_space<vmem>>, %arg5: memref<1x1x8xf32, #tpu.memory_space<vmem>>, %arg6: memref<1x1x8xf32, #tpu.memory_space<vmem>>) attributes {dimension_semantics = [#tpu.dimension_semantics<parallel>, #tpu.dimension_semantics<arbitrary>], iteration_bounds = array<i64: 2, 1>, scalar_prefetch = 0 : i64, scratch_operands = 0 : i64, tpu.core_type = #tpu.core_type<tc>, window_params = [{transform_indices = @transform_0, window_bounds = array<i64: 1, 16, 8>}, {pipeline_mode = #tpu.pipeline_mode<synchronous>, transform_indices = @transform_1, window_bounds = array<i64: 8, 8>}, {pipeline_mode = #tpu.pipeline_mode<synchronous>, transform_indices = @transform_2, window_bounds = array<i64: 1, 8>}, {transform_indices = @transform_3, window_bounds = array<i64: 1, 1, 8>}, {transform_indices = @transform_4, window_bounds = array<i64: 1, 1, 8>}]} {
    %c0_i32 = arith.constant 0 : i32
    %0 = arith.cmpi eq, %arg1, %c0_i32 : i32
    %1 = arith.extui %0 : i1 to i32
    %c0_i32_0 = arith.constant 0 : i32
    %2 = arith.cmpi ne, %1, %c0_i32_0 : i32
    scf.if %2 {
      %cst_21 = arith.constant 0.000000e+00 : f32
      %23 = vector.broadcast %cst_21 : f32 to vector<1x1x8xf32>
      %c0_22 = arith.constant 0 : index
      %c0_23 = arith.constant 0 : index
      %c0_24 = arith.constant 0 : index
      %24 = vector.load %arg5[%c0_22, %c0_23, %c0_24] : memref<1x1x8xf32, #tpu.memory_space<vmem>>, vector<1x1x8xf32>
      tpu.vector_store %arg5[%c0_22, %c0_23, %c0_24], %23 {strides = array<i32>} : memref<1x1x8xf32, #tpu.memory_space<vmem>>, vector<1x1x8xf32>,
      %cst_25 = arith.constant 0.000000e+00 : f32
      %25 = vector.broadcast %cst_25 : f32 to vector<1x1x8xf32>
      %c0_26 = arith.constant 0 : index
      %c0_27 = arith.constant 0 : index
      %c0_28 = arith.constant 0 : index
      %26 = vector.load %arg6[%c0_26, %c0_27, %c0_28] : memref<1x1x8xf32, #tpu.memory_space<vmem>>, vector<1x1x8xf32>
      tpu.vector_store %arg6[%c0_26, %c0_27, %c0_28], %25 {strides = array<i32>} : memref<1x1x8xf32, #tpu.memory_space<vmem>>, vector<1x1x8xf32>,
    } else {
    }
    %c0 = arith.constant 0 : index
    %c0_1 = arith.constant 0 : index
    %c0_2 = arith.constant 0 : index
    %3 = vector.load %arg2[%c0, %c0_1, %c0_2] : memref<1x16x8xf32, #tpu.memory_space<vmem>>, vector<1x16x8xf32>
    %4 = vector.shape_cast %3 : vector<1x16x8xf32> to vector<16x8xf32>
    %c0_3 = arith.constant 0 : index
    %c0_4 = arith.constant 0 : index
    %5 = vector.load %arg3[%c0_3, %c0_4] : memref<8x8xf32, #tpu.memory_space<vmem>>, vector<8x8xf32>
    %cst = arith.constant dense<0.000000e+00> : vector<16x8xf32>
    %6 = tpu.matmul %4, %5, %cst {dimension_numbers = #tpu.dot_dimension_numbers<[1], [0], [0], [1], [0, 0, 1, 1], [], []>} : vector<16x8xf32>, vector<8x8xf32>, vector<16x8xf32> -> vector<16x8xf32>
    %c0_5 = arith.constant 0 : index
    %c0_6 = arith.constant 0 : index
    %7 = vector.load %arg4[%c0_5, %c0_6] : memref<1x8xf32, #tpu.memory_space<vmem>>, vector<1x8xf32>
    %8 = vector.broadcast %7 : vector<1x8xf32> to vector<16x8xf32>
    %9 = arith.addf %6, %8 : vector<16x8xf32>
    %c0_7 = arith.constant 0 : index
    %c0_8 = arith.constant 0 : index
    %c0_9 = arith.constant 0 : index
    %10 = vector.load %arg5[%c0_7, %c0_8, %c0_9] : memref<1x1x8xf32, #tpu.memory_space<vmem>>, vector<1x1x8xf32>
    %cst_10 = arith.constant dense<0.000000e+00> : vector<8xf32>
    %11 = vector.multi_reduction <add>, %9, %cst_10 [0] : vector<16x8xf32> to vector<8xf32>
    %12 = vector.shape_cast %11 : vector<8xf32> to vector<1x8xf32>
    %13 = vector.shape_cast %12 : vector<1x8xf32> to vector<1x1x8xf32>
    %14 = arith.addf %10, %13 : vector<1x1x8xf32>
    %c0_11 = arith.constant 0 : index
    %c0_12 = arith.constant 0 : index
    %c0_13 = arith.constant 0 : index
    %15 = vector.load %arg5[%c0_11, %c0_12, %c0_13] : memref<1x1x8xf32, #tpu.memory_space<vmem>>, vector<1x1x8xf32>
    tpu.vector_store %arg5[%c0_11, %c0_12, %c0_13], %14 {strides = array<i32>} : memref<1x1x8xf32, #tpu.memory_space<vmem>>, vector<1x1x8xf32>,
    %c0_14 = arith.constant 0 : index
    %c0_15 = arith.constant 0 : index
    %c0_16 = arith.constant 0 : index
    %16 = vector.load %arg6[%c0_14, %c0_15, %c0_16] : memref<1x1x8xf32, #tpu.memory_space<vmem>>, vector<1x1x8xf32>
    %17 = arith.mulf %9, %9 : vector<16x8xf32>
    %cst_17 = arith.constant dense<0.000000e+00> : vector<8xf32>
    %18 = vector.multi_reduction <add>, %17, %cst_17 [0] : vector<16x8xf32> to vector<8xf32>
    %19 = vector.shape_cast %18 : vector<8xf32> to vector<1x8xf32>
    %20 = vector.shape_cast %19 : vector<1x8xf32> to vector<1x1x8xf32>
    %21 = arith.addf %16, %20 : vector<1x1x8xf32>
    %c0_18 = arith.constant 0 : index
    %c0_19 = arith.constant 0 : index
    %c0_20 = arith.constant 0 : index
    %22 = vector.load %arg6[%c0_18, %c0_19, %c0_20] : memref<1x1x8xf32, #tpu.memory_space<vmem>>, vector<1x1x8xf32>
    tpu.vector_store %arg6[%c0_18, %c0_19, %c0_20], %21 {strides = array<i32>} : memref<1x1x8xf32, #tpu.memory_space<vmem>>, vector<1x1x8xf32>,
    return
  }
  func.func @transform_0(%arg0: i32, %arg1: i32) -> (i32, i32, i32) {
    %c0_i32 = arith.constant 0 : i32
    %c0_i32_0 = arith.constant 0 : i32
    return %arg0, %arg1, %c0_i32 : i32, i32, i32
  }
  func.func @transform_1(%arg0: i32, %arg1: i32) -> (i32, i32) {
    %c0_i32 = arith.constant 0 : i32
    %c0_i32_0 = arith.constant 0 : i32
    %c0_i32_1 = arith.constant 0 : i32
    return %c0_i32, %c0_i32_0 : i32, i32
  }
  func.func @transform_2(%arg0: i32, %arg1: i32) -> (i32, i32) {
    %c0_i32 = arith.constant 0 : i32
    %c0_i32_0 = arith.constant 0 : i32
    %c0_i32_1 = arith.constant 0 : i32
    return %c0_i32, %c0_i32_0 : i32, i32
  }
  func.func @transform_3(%arg0: i32, %arg1: i32) -> (i32, i32, i32) {
    %c0_i32 = arith.constant 0 : i32
    %c0_i32_0 = arith.constant 0 : i32
    %c0_i32_1 = arith.constant 0 : i32
    return %arg0, %c0_i32, %c0_i32_0 : i32, i32, i32
  }
  func.func @transform_4(%arg0: i32, %arg1: i32) -> (i32, i32, i32) {
    %c0_i32 = arith.constant 0 : i32
    %c0_i32_0 = arith.constant 0 : i32
    %c0_i32_1 = arith.constant 0 : i32
    return %arg0, %c0_i32, %c0_i32_0 : i32, i32, i32
  }
}

</mosaic_0001>

<bundles_post_ra>
// kernel: se_module.3
= control target key start
LH: loop header
LB: loop body
LE: loop exit
PB: predicated region body
PF: predicated region fallthrough
CT: control target
= control target key end

     0   :  { %s818_s24 = smov 0   ;;  %s820_s25 = smov 0   ;;  %s883_s0 = inlined_call_operand.vmem [shape: f32[2,16,8], index: 0, kind: input, shape index: {}]   ;;  %s884_s1 = inlined_call_operand.vmem [shape: f32[8,8], index: 1, kind: input, shape index: {}]   ;;  %s885_s2 = inlined_call_operand.vmem [shape: f32[1,8], index: 2, kind: input, shape index: {}]   ;;  %s886_s3 = inlined_call_operand.vmem [shape: f32[8,4], index: 3, kind: input, shape index: {}]   ;;  %s887_s4 = inlined_call_operand.vmem [shape: f32[1,4], index: 4, kind: input, shape index: {}]   ;;  %s888_s5 = inlined_call_operand.vmem [shape: f32[4,8], index: 5, kind: input, shape index: {}]   ;;  %s889_s6 = inlined_call_operand.vmem [shape: f32[1,8], index: 6, kind: input, shape index: {}]   ;;  %s890_s7 = inlined_call_operand.vmem [shape: f32[2,16,8], index: 7, kind: output, shape index: {}]  }
   0x1   :  { %s822_s26 = smov 0  }
   0x2 LB: > { %s29_s27 = sadd.s32 1, %s770_s25  ;;  %p669_p0 = scmp.ge.s32.totalorder %s774_s26, 1  ;;  %s774_s26 = sphi %s822_s26, %s17_s26   ;;  %s770_s25 = sphi %s820_s25, %s892_s25   ;;  %s766_s24 = sphi %s818_s24, %s891_s24  }
   0x3   : > { %p31_p1 = scmp.ge.s32.totalorder %s29_s27, 2  ;;  %p256_p2 = scmp.lt.s32.totalorder %s774_s26, 3 }
   0x5   : > { %s894_s27 = smov (%p31_p1, %s29_s27), 0  ;;  %p257_p3 = pnand %p669_p0, %p256_p2 }
   0x6   : > { %v309_v0 = vld [vmem:[%s884_s1] sm:$0xff] (!%p257_p3)  ;;  %p293_p4 = scmp.lt.s32.totalorder (!%p257_p3), %s766_s24, 1  ;;  %vm317_vm0 = vcmask (!%p257_p3), 64512   ;;  %v776_v4 = vmov (!%p257_p3), 0.0   ;;  %vm777_vm1 = vmmov (!%p257_p3), 0   ;;  %vm508_vm2 = vcmask (!%p257_p3), 1043456  }
   0x7   : > { %260 = sbr.rel (%p257_p3) target bundleno = 762 (0x2fa), region = 48  ;;  %695 = vmatprep.subr.mxu0 (!%p257_p3), %v309_v0  ;;  %v421_v3 = vld [vmem:[%s886_s3] sm:$0xff] (!%p257_p3)  ;;  %700 = vmatprep.subr.mxu1 (!%p257_p3), %v776_v4  ;;  %vm504_vm3 = vcmask (!%p257_p3), 31744   ;;  %v588_v44 = vlaneseq (!%p257_p3) }
   0x8   : > { %696 = vmatpush3.msra.mxu0 (!%p257_p3), %v309_v0  ;;  %702 = vmatprep.mubr.msk.f32.mxu1 (!%p257_p3), %vm777_vm1, %v776_v4  ;;  %v674_v5 = vld [vmem:[%s885_s2] ss:$0 sm:$0xff] (!%p257_p3) }
   0x9   : > { %701 = vmatpush3.msra.mxu1 (!%p257_p3), %v421_v3  ;;  %705 = vmatprep.subr.mxu0 (!%p257_p3), %v776_v4  ;;  %v502_v28 = vld [vmem:[%s888_s5] sm:$0xf] (!%p257_p3)  ;;  %v589_v45 = vshrl.u32 (!%p257_p3), %v588_v44, 7 }
   0xa   : > { %v422_v29 = vld [vmem:[%s887_s4] sm:$0x1] (!%p257_p3) }
   0xb   : > { %v503_v37 = vld [vmem:[%s889_s6] sm:$0x1] (!%p257_p3)  ;;  %v590_v46 = vsub.s32 (!%p257_p3), 0, %v589_v45 }
   0xe   : > { %s896_s24 = smov (!%p293_p4, %s766_s24), 1 }
   0xf   : > { %s686_s30 = sshll.u32 %s896_s24, 4 }
  0x10   : > { %s300_s10 = scalar_lea.vmem %s883_s0, %s686_s30  ;;  %s306_s23 = scalar_lea.vmem %s890_s7, %s686_s30 }
  0x11   : > { %v307_v1 = vld [vmem:[%s300_s10] sm:$0xff]  ;;  %v308_v2 = vld [vmem:[%s300_s10 + $0x8] sm:$0xff] }
  0x12   : > { %697 = vmatprep.mubr.msk.f32.mxu0 %vm317_vm0, %v307_v1 }
  0x13   : > { %698 = vmatmul.mubr.msk.f32.vlgmr.msra.gmra.mrb[0].mxu0 %vm317_vm0, %v308_v2 }
  0x14   : > { %707 = vmatprep.mubr.msk.f32.mxu0 %vm777_vm1, %v776_v4  ;;  %706 = vmatpush3.msk.msra.mxu0 %vm508_vm2, %v502_v28 }
  0xe6   : > { %v699_v6 = vpop.f32.mrb[0].mxu0 }
  0xe7   : > { %v396_v7 = vadd.f32 %v699_v6, %v674_v5  ;;  %v390_v8 = vpop.f32.mrb[1].mxu0 }
  0xe8   : > { %v391_v9 = vadd.f32 %v674_v5, %v390_v8 }
  0xe9   : > { %v678_v10 = vmul.f32 -1.442695, %v396_v7 }
  0xea   : > { %v677_v11 = vmul.f32 -1.442695, %v391_v9 }
  0xeb   : > { %736 = vpow2.f32 %v678_v10 }
  0xec   : > { %738 = vpow2.f32 %v677_v11 }
  0xf5   : > { %v737_v12 = vpop.eup %736 }
  0xf6   : > { %v739_v13 = vpop.eup %738  ;;  %v406_v14 = vadd.f32 1.0, %v737_v12 }
  0xf7   : > { %v405_v15 = vadd.f32 1.0, %v739_v13 }
  0xf8   : > { %740 = vrcp.f32 %v406_v14 }
  0xf9   : > { %742 = vrcp.f32 %v405_v15 }
 0x102   : > { %v741_v16 = vpop.eup %740 }
 0x103   : > { %v743_v17 = vpop.eup %742  ;;  %v412_v18 = vsel %vm317_vm0, %v741_v16, 0.0 }
 0x104   : > { %v411_v19 = vsel %vm317_vm0, %v743_v17, 0.0 }
 0x105   : > { %v413_v20 = vadd.f32 %v412_v18, %v411_v19 }
 0x107   : > { %v414_v21 = vrot.slane %v413_v20, 4 }
 0x109   : > { %v415_v22 = vadd.f32 %v414_v21, %v413_v20 }
 0x10b   : > { %v416_v23 = vrot.slane %v415_v22, 2 }
 0x10d   : > { %v417_v24 = vadd.f32 %v416_v23, %v415_v22 }
 0x10f   : > { %v418_v25 = vrot.slane %v417_v24, 1 }
 0x111   : > { %v419_v26 = vadd.f32 %v418_v25, %v417_v24 }
 0x113   : > { %v420_v27 = vmul.f32 0.0625, %v419_v26 }
 0x115   : > { %703 = vmatmul.mubr.msk.f32.vlgmr.msra.gmra.mrb[0].mxu1 %vm317_vm0, %v420_v27 }
 0x1e8   : > { %v492_v30 = vpop.f32.mrb[0].mxu1 }
 0x1e9   : > { %v493_v31 = vadd.f32 %v492_v30, %v422_v29  ;;  %v704_v32 = vpop.f32.mrb[1].mxu1 }
 0x1eb   : > { %v680_v33 = vmul.f32 -1.442695, %v493_v31 }
 0x1ed   : > { %744 = vpow2.f32 %v680_v33 }
 0x1f7   : > { %v745_v34 = vpop.eup %744 }
 0x1f8   : > { %v499_v35 = vadd.f32 1.0, %v745_v34 }
 0x1fa   : > { %746 = vrcp.f32 %v499_v35 }
 0x204   : > { %v747_v36 = vpop.eup %746 }
 0x205   : > { %708 = vmatmul.mubr.msk.f32.vlgmr.msra.gmra.mrb[2].mxu0 %vm504_vm3, %v747_v36 }
 0x2d8   : > { %v578_v38 = vpop.f32.mrb[2].mxu0 }
 0x2d9   : > { %v579_v39 = vadd.f32 %v578_v38, %v503_v37  ;;  %v709_v40 = vpop.f32.mrb[3].mxu0 }
 0x2db   : > { %v683_v41 = vmul.f32 -1.442695, %v579_v39 }
 0x2dd   : > { %748 = vpow2.f32 %v683_v41 }
 0x2e7   : > { %v749_v42 = vpop.eup %748 }
 0x2e8   : > { %v585_v43 = vadd.f32 1.0, %v749_v42 }
 0x2ea   : > { %750 = vrcp.f32 %v585_v43 }
 0x2f4   : > { %v751_v47 = vpop.eup %750 }
 0x2f5   : > { %v591_v48 = vrot.slane %v751_v47, %v590_v46 }
 0x2f7   : > { %v592_v49 = vmul.f32 %v743_v17, %v591_v48  ;;  %v593_v50 = vmul.f32 %v741_v16, %v591_v48 }
 0x2f9   : > { %594 = vst.msk [vmem:[%s306_s23] sm:$0xff] %vm317_vm0, %v592_v49  ;;  %595 = vst.msk [vmem:[%s306_s23 + $0x8] sm:$0xff] %vm317_vm0, %v593_v50 }
 0x2fa PF: > { %s17_s26 = sadd.s32 1, %s774_s26   ;;  %s891_s24 = smov %s770_s25 }
 0x2fb   : > { %p14_p5 = scmp.ge.s32.totalorder %s17_s26, 4   ;;  %s892_s25 = smov %s894_s27 }
 0x2fd   :  { %16 = sbr.rel (!%p14_p5) target bundleno = 2 (0x2), region = 78 }

// kernel: se_module.2
= control target key start
LH: loop header
LB: loop body
LE: loop exit
PB: predicated region body
PF: predicated region fallthrough
CT: control target
= control target key end

     0   :  { %s539_s15 = smov 0   ;;  %s541_s16 = smov 0   ;;  %s601_s0 = inlined_call_operand.vmem [shape: f32[2,16,8], index: 0, kind: input, shape index: {}]   ;;  %s602_s1 = inlined_call_operand.vmem [shape: f32[8,8], index: 1, kind: input, shape index: {}]   ;;  %s603_s2 = inlined_call_operand.vmem [shape: f32[1,8], index: 2, kind: input, shape index: {}]   ;;  %s604_s3 = inlined_call_operand.vmem [shape: f32[2,1,8], index: 3, kind: output, shape index: {0}]   ;;  %s605_s4 = inlined_call_operand.vmem [shape: f32[2,1,8], index: 4, kind: output, shape index: {1}]  }
   0x1   :  { %s543_s17 = smov 0  }
   0x2 LB: > { %s27_s18 = sadd.s32 1, %s507_s16  ;;  %p447_p0 = scmp.ge.s32.totalorder %s511_s17, 1  ;;  %s511_s17 = sphi %s543_s17, %s15_s17   ;;  %s507_s16 = sphi %s541_s16, %s607_s16   ;;  %s503_s15 = sphi %s539_s15, %s606_s15  }
   0x3   : > { %p29_p1 = scmp.ge.s32.totalorder %s27_s18, 2  ;;  %p184_p2 = scmp.lt.s32.totalorder %s511_s17, 3 }
   0x5   : > { %s609_s18 = smov (%p29_p1, %s27_s18), 0  ;;  %p185_p3 = pnand %p447_p0, %p184_p2 }
   0x6   : > { %v240_v0 = vld [vmem:[%s602_s1] sm:$0xff] (!%p185_p3)  ;;  %p216_p4 = scmp.lt.s32.totalorder (!%p185_p3), %s503_s15, 1  ;;  %vm235_vm0 = vcmask (!%p185_p3), 57344   ;;  %vm248_vm1 = vcmask (!%p185_p3), 64512   ;;  %v513_v1 = vmov (!%p185_p3), 0.0  }
   0x7   : > { %188 = sbr.rel (%p185_p3) target bundleno = 254 (0xfe), region = 32  ;;  %459 = vmatprep.subr.mxu0 (!%p185_p3), %v240_v0  ;;  %v450_v4 = vld [vmem:[%s603_s2] ss:$0 sm:$0xff] (!%p185_p3) }
   0x8   : > { %460 = vmatpush3.msra.mxu0 (!%p185_p3), %v240_v0 }
   0xe   : > { %s611_s15 = smov (!%p216_p4, %s503_s15), 1 }
   0xf   : > { %s455_s21 = sshll.u32 %s611_s15, 4  ;;  %s563_s24 = scalar_lea.vmem %s604_s3, %s611_s15 }
  0x10   : > { %s223_s27 = scalar_lea.vmem %s601_s0, %s455_s21  ;;  %s571_s30 = scalar_lea.vmem %s605_s4, %s611_s15  ;;  %236 = vst.msk [vmem:[%s563_s24] sm:$0x1] %vm235_vm0, %v513_v1 }
  0x11   : > { %237 = vst.msk [vmem:[%s571_s30] sm:$0x1] %vm235_vm0, %v513_v1  ;;  %v238_v2 = vld [vmem:[%s223_s27] sm:$0xff]  ;;  %v239_v3 = vld [vmem:[%s223_s27 + $0x8] sm:$0xff] }
  0x12   : > { %461 = vmatprep.mubr.msk.f32.mxu0 %vm248_vm1, %v238_v2 }
  0x13   : > { %462 = vmatmul.mubr.msk.f32.vlgmr.msra.gmra.mrb[0].mxu0 %vm248_vm1, %v239_v3 }
  0x17   : > { %v330_v26 = vld [vmem:[%s563_s24] sm:$0x1] }
  0x18   : > { %v343_v29 = vld [vmem:[%s571_s30] sm:$0x1] }
  0xe6   : > { %v463_v5 = vpop.f32.mrb[0].mxu0 }
  0xe7   : > { %v327_v6 = vadd.f32 %v463_v5, %v450_v4  ;;  %v321_v7 = vpop.f32.mrb[1].mxu0 }
  0xe8   : > { %v322_v8 = vadd.f32 %v450_v4, %v321_v7 }
  0xe9   : > { %v332_v9 = vsel %vm248_vm1, %v327_v6, 0.0  ;;  %v345_v10 = vmul.f32 %v327_v6, %v327_v6 }
  0xea   : > { %v331_v11 = vsel %vm248_vm1, %v322_v8, 0.0  ;;  %v344_v12 = vmul.f32 %v322_v8, %v322_v8 }
  0xeb   : > { %v347_v13 = vsel %vm248_vm1, %v345_v10, 0.0  ;;  %v333_v14 = vadd.f32 %v332_v9, %v331_v11 }
  0xec   : > { %v346_v15 = vsel %vm248_vm1, %v344_v12, 0.0 }
  0xed   : > { %v334_v16 = vrot.slane %v333_v14, 4  ;;  %v348_v17 = vadd.f32 %v347_v13, %v346_v15 }
  0xef   : > { %v335_v18 = vadd.f32 %v334_v16, %v333_v14  ;;  %v349_v19 = vrot.slane %v348_v17, 4 }
  0xf1   : > { %v336_v20 = vrot.slane %v335_v18, 2  ;;  %v350_v21 = vadd.f32 %v349_v19, %v348_v17 }
  0xf3   : > { %v337_v22 = vadd.f32 %v336_v20, %v335_v18  ;;  %v351_v23 = vrot.slane %v350_v21, 2 }
  0xf5   : > { %v338_v24 = vrot.slane %v337_v22, 1  ;;  %v352_v25 = vadd.f32 %v351_v23, %v350_v21 }
  0xf7   : > { %v339_v27 = vadd.f32 %v338_v24, %v337_v22  ;;  %v353_v28 = vrot.slane %v352_v25, 1 }
  0xf9   : > { %v340_v30 = vadd.f32 %v339_v27, %v330_v26  ;;  %v354_v31 = vadd.f32 %v353_v28, %v352_v25 }
  0xfb   : > { %342 = vst.msk [vmem:[%s563_s24] sm:$0x1] %vm235_vm0, %v340_v30  ;;  %v355_v32 = vadd.f32 %v354_v31, %v343_v29 }
  0xfd   : > { %356 = vst.msk [vmem:[%s571_s30] sm:$0x1] %vm235_vm0, %v355_v32 }
  0xfe PF: > { %s15_s17 = sadd.s32 1, %s511_s17   ;;  %s606_s15 = smov %s507_s16 }
  0xff   : > { %p12_p5 = scmp.ge.s32.totalorder %s15_s17, 4   ;;  %s607_s16 = smov %s609_s18 }
 0x101   :  { %14 = sbr.rel (!%p12_p5) target bundleno = 2 (0x2), region = 78 }

</bundles_post_ra>
